<compile_context>
chip_gen: v5e
topology: v5e:2x2
jax: 0.10.0
libtpu: 0.0.40
codegen_flags: <defaults>
</compile_context>

<pallas_src>
import jax
import jax.numpy as jnp
from jax.experimental import pallas as pl
from jax.experimental.pallas import tpu as pltpu


def _matmul_bias_kernel(w_ref, p_ref, b_ref, o_ref):
    # w_ref: (Cout, Kp) bf16   p_ref: (Kp, tile_m) bf16
    # b_ref: (Cout, 1)  f32    o_ref: (Cout, tile_m) f32
    acc = jax.lax.dot_general(
        w_ref[...], p_ref[...],
        dimension_numbers=(((1,), (0,)), ((), ())),   # [Cout,K] @ [K,M]
        preferred_element_type=jnp.float32,
    )
    o_ref[...] = (acc + b_ref[...]).astype(o_ref.dtype)


def _pick_tile_m(m_pad):
    """Largest lane-dense M tile (<=1024) that still yields >=2 grid steps
    (so v7x megacore has parallel work); single tile for tiny M."""
    if m_pad <= 256:
        return m_pad
    half = m_pad // 2
    for t in (1024, 512, 256, 128):
        if t <= half and m_pad % t == 0:
            return t
    return m_pad


def conv2d_pallas(x_nchw, weight_oihw, bias, *, stride=1, padding=1, dilation=1):
    """Equivalent of nn.Conv2d(in, out, k, stride, padding, dilation, bias=True)."""
    N, Cin, H, W = x_nchw.shape
    Cout, Cin_w, KH, KW = weight_oihw.shape
    assert Cin == Cin_w

    Hp = H + 2 * padding
    Wp = W + 2 * padding
    OH = (Hp - dilation * (KH - 1) - 1) // stride + 1
    OW = (Wp - dilation * (KW - 1) - 1) // stride + 1
    K = KH * KW * Cin
    M = N * OH * OW

    # ---------------- wrapper-side layout plumbing (plain XLA ops) ----------
    x_nhwc = jnp.transpose(x_nchw, (0, 2, 3, 1))
    x_pad = jnp.pad(x_nhwc, ((0, 0), (padding, padding), (padding, padding), (0, 0)))

    # im2col: build the [K, M] patches operand, K = (kh, kw, c) on sublanes,
    # M = (n, oh, ow) lane-dense.
    taps = []
    for kh in range(KH):
        for kw in range(KW):
            h0 = kh * dilation
            w0 = kw * dilation
            tap = jax.lax.slice(
                x_pad,
                (0, h0, w0, 0),
                (N, h0 + (OH - 1) * stride + 1, w0 + (OW - 1) * stride + 1, Cin),
                (1, stride, stride, 1),
            )                                               # (N, OH, OW, Cin)
            taps.append(tap)
    patches = jnp.stack(taps, axis=0)                       # (KH*KW, N, OH, OW, Cin)
    patches = jnp.transpose(patches, (0, 4, 1, 2, 3))       # (KH*KW, Cin, N, OH, OW)
    patches = patches.reshape(K, M)

    # Pad K to a sublane multiple and M to a lane multiple (zero columns/rows
    # contribute nothing; padded M columns are sliced off below).
    k_pad = -(-K // 8) * 8
    m_pad = -(-M // 128) * 128
    if (k_pad != K) or (m_pad != M):
        patches = jnp.pad(patches, ((0, k_pad - K), (0, m_pad - M)))
    patches = patches.astype(jnp.bfloat16)

    # OIHW -> [Cout, KH, KW, Cin] -> [Cout, K]; same (kh, kw, c) column order.
    w2 = jnp.transpose(weight_oihw, (0, 2, 3, 1)).reshape(Cout, K)
    if k_pad != K:
        w2 = jnp.pad(w2, ((0, 0), (0, k_pad - K)))
    w2 = w2.astype(jnp.bfloat16)
    b2 = bias.reshape(Cout, 1).astype(jnp.float32)          # epilogue stays f32

    tile_m = _pick_tile_m(m_pad)
    n_blocks = m_pad // tile_m

    out = pl.pallas_call(
        _matmul_bias_kernel,
        out_shape=jax.ShapeDtypeStruct((Cout, m_pad), x_nchw.dtype),
        grid_spec=pltpu.PrefetchScalarGridSpec(
            num_scalar_prefetch=0,
            grid=(n_blocks,),
            in_specs=[
                pl.BlockSpec((Cout, k_pad), lambda i: (0, 0)),
                pl.BlockSpec((k_pad, tile_m), lambda i: (0, i)),
                pl.BlockSpec((Cout, 1), lambda i: (0, 0)),
            ],
            out_specs=pl.BlockSpec((Cout, tile_m), lambda i: (0, i)),
        ),
        compiler_params=pltpu.CompilerParams(
            dimension_semantics=("parallel",),
        ),
    )(w2, patches, b2)

    # [Cout, (n, oh, ow)] -> NCHW (small wrapper-side transpose).
    out = out[:, :M].reshape(Cout, N, OH, OW)
    return jnp.transpose(out, (1, 0, 2, 3))


def _reference_conv(x_nchw, weight_oihw, bias, *, stride, padding, dilation):
    out = jax.lax.conv_general_dilated(
        x_nchw,
        weight_oihw,
        window_strides=(stride, stride),
        padding=((padding, padding), (padding, padding)),
        rhs_dilation=(dilation, dilation),
        dimension_numbers=("NCHW", "OIHW", "NCHW"),
    )
    return out + bias.reshape(1, -1, 1, 1)


def _check(x, weight, bias, *, stride, padding, dilation):
    out = conv2d_pallas(x, weight, bias, stride=stride, padding=padding, dilation=dilation)
    out = jax.block_until_ready(out)
    # Tight check vs. a reference with identical bf16 operand rounding
    # (products identical; only f32 accumulation order differs).
    x_bf = x.astype(jnp.bfloat16).astype(jnp.float32)
    w_bf = weight.astype(jnp.bfloat16).astype(jnp.float32)
    ref_bf = _reference_conv(x_bf, w_bf, bias, stride=stride, padding=padding, dilation=dilation)
    assert out.shape == ref_bf.shape, (out.shape, ref_bf.shape)
    assert jnp.allclose(out, ref_bf, atol=2e-3, rtol=2e-3), "mismatch vs bf16-rounded reference"
    # Loose sanity check vs. full-f32 reference (bf16 operand error budget).
    ref_f32 = _reference_conv(x, weight, bias, stride=stride, padding=padding, dilation=dilation)
    assert jnp.allclose(out, ref_f32, atol=5e-2, rtol=5e-2), "mismatch vs f32 reference"
    return out


if __name__ == "__main__":
    # Module config: conv2D(in_channels=4, n_filters=8, k_size=3, stride=1, padding=1)
    in_channels, n_filters, k_size = 4, 8, 3
    N, H, W = 2, 16, 16

    key = jax.random.PRNGKey(0)
    kx, kw_, kb = jax.random.split(key, 3)

    x = jax.random.normal(kx, (N, in_channels, H, W), dtype=jnp.float32)

    # Deterministic init mimicking PyTorch Conv2d default (uniform +/- 1/sqrt(fan_in)).
    fan_in = in_channels * k_size * k_size
    bound = 1.0 / (fan_in ** 0.5)
    weight = jax.random.uniform(
        kw_, (n_filters, in_channels, k_size, k_size),
        minval=-bound, maxval=bound, dtype=jnp.float32,
    )
    bias = jax.random.uniform(
        kb, (n_filters,), minval=-bound, maxval=bound, dtype=jnp.float32
    )

    # Default module config (stride=1, padding=1, dilation=1).
    out = _check(x, weight, bias, stride=1, padding=1, dilation=1)
    assert out.shape == (N, n_filters, H, W), out.shape

    # Also exercise the stride>1 and dilation>1 branches of the module.
    _check(x, weight, bias, stride=2, padding=1, dilation=1)
    _check(x, weight, bias, stride=1, padding=2, dilation=2)

    print("KERNEL_OK")
</pallas_src>

<mosaic_0001>
module attributes {stable_mosaic.version = 11 : i64} {
  func.func @_matmul_bias_kernel(%arg0: i32, %arg1: memref<8x40xbf16, #tpu.memory_space<vmem>>, %arg2: memref<40x256xbf16, #tpu.memory_space<vmem>>, %arg3: memref<8x1xf32, #tpu.memory_space<vmem>>, %arg4: memref<8x256xf32, #tpu.memory_space<vmem>>) attributes {dimension_semantics = [#tpu.dimension_semantics<parallel>], iteration_bounds = array<i64: 2>, scalar_prefetch = 0 : i64, scratch_operands = 0 : i64, tpu.core_type = #tpu.core_type<tc>, window_params = [{pipeline_mode = #tpu.pipeline_mode<synchronous>, transform_indices = @transform_0, window_bounds = array<i64: 8, 40>}, {transform_indices = @transform_1, window_bounds = array<i64: 40, 256>}, {pipeline_mode = #tpu.pipeline_mode<synchronous>, transform_indices = @transform_2, window_bounds = array<i64: 8, 1>}, {transform_indices = @transform_3, window_bounds = array<i64: 8, 256>}]} {
    %c0 = arith.constant 0 : index
    %c0_0 = arith.constant 0 : index
    %0 = vector.load %arg1[%c0, %c0_0] : memref<8x40xbf16, #tpu.memory_space<vmem>>, vector<8x40xbf16>
    %c0_1 = arith.constant 0 : index
    %c0_2 = arith.constant 0 : index
    %1 = vector.load %arg2[%c0_1, %c0_2] : memref<40x256xbf16, #tpu.memory_space<vmem>>, vector<40x256xbf16>
    %cst = arith.constant dense<0.000000e+00> : vector<8x256xf32>
    %2 = tpu.matmul %0, %1, %cst {dimension_numbers = #tpu.dot_dimension_numbers<[1], [0], [0], [1], [0, 0, 1, 1], [], []>} : vector<8x40xbf16>, vector<40x256xbf16>, vector<8x256xf32> -> vector<8x256xf32>
    %c0_3 = arith.constant 0 : index
    %c0_4 = arith.constant 0 : index
    %3 = vector.load %arg3[%c0_3, %c0_4] : memref<8x1xf32, #tpu.memory_space<vmem>>, vector<8x1xf32>
    %4 = vector.broadcast %3 : vector<8x1xf32> to vector<8x256xf32>
    %5 = arith.addf %2, %4 : vector<8x256xf32>
    %c0_5 = arith.constant 0 : index
    %c0_6 = arith.constant 0 : index
    %6 = vector.load %arg4[%c0_5, %c0_6] : memref<8x256xf32, #tpu.memory_space<vmem>>, vector<8x256xf32>
    tpu.vector_store %arg4[%c0_5, %c0_6], %5 {strides = array<i32>} : memref<8x256xf32, #tpu.memory_space<vmem>>, vector<8x256xf32>,
    return
  }
  func.func @transform_0(%arg0: i32) -> (i32, i32) {
    %c0_i32 = arith.constant 0 : i32
    %c0_i32_0 = arith.constant 0 : i32
    %c0_i32_1 = arith.constant 0 : i32
    return %c0_i32, %c0_i32_0 : i32, i32
  }
  func.func @transform_1(%arg0: i32) -> (i32, i32) {
    %c0_i32 = arith.constant 0 : i32
    %c0_i32_0 = arith.constant 0 : i32
    return %c0_i32, %arg0 : i32, i32
  }
  func.func @transform_2(%arg0: i32) -> (i32, i32) {
    %c0_i32 = arith.constant 0 : i32
    %c0_i32_0 = arith.constant 0 : i32
    %c0_i32_1 = arith.constant 0 : i32
    return %c0_i32, %c0_i32_0 : i32, i32
  }
  func.func @transform_3(%arg0: i32) -> (i32, i32) {
    %c0_i32 = arith.constant 0 : i32
    %c0_i32_0 = arith.constant 0 : i32
    return %c0_i32, %arg0 : i32, i32
  }
}

</mosaic_0001>

<bundles_post_ra>
// kernel: tpu_custom_call.1
= control target key start
LH: loop header
LB: loop body
LE: loop exit
PB: predicated region body
PF: predicated region fallthrough
CT: control target
= control target key end

     0   :  { %8 = vsyncpa [#allocation3], 0  ;;  %s694_s0 = inlined_call_operand.vmem [shape: bf16[8,40], index: 0, kind: input, shape index: {}]   ;;  %s695_s1 = inlined_call_operand.hbm [shape: bf16[40,512], index: 1, kind: input, shape index: {}]   ;;  %s696_s2 = inlined_call_operand.vmem [shape: f32[8,1], index: 2, kind: input, shape index: {}]   ;;  %s697_s3 = inlined_call_operand.hbm [shape: f32[8,512], index: 3, kind: output, shape index: {}]  }
   0x1   :  { %10 = vsyncpa [#allocation3 + $0x1], 0 }
   0x2   :  { %11 = vsyncpa [#allocation4], 0 }
   0x3   :  { %13 = vsyncpa [#allocation4 + $0x1], 0  ;;  %s568_s12 = smov 0   ;;  %s570_s13 = smov 0  }
   0x4   :  { %s572_s14 = smov 0   ;;  %s574_s15 = smov 0  }
   0x5 LB: > { %s589_s16 = sadd.s32 4294967295, %s542_s15   ;;  %s357_s17 = sadd.s32 4294967294, %s542_s15   ;;  %s542_s15 = sphi %s574_s15, %s705_s15   ;;  %s538_s14 = sphi %s572_s14, %s704_s14   ;;  %s534_s13 = sphi %s570_s13, %s703_s13   ;;  %s530_s12 = sphi %s568_s12, %s702_s12  }
   0x6   : > { %s593_s18 = sadd.s32 1, %s542_s15   ;;  %s47_s19 = sadd.s32 1, %s538_s14 }
   0x7   : > { %s44_s20 = ssub.s32 %s542_s15, %s593_s18  ;;  %p54_p0 = scmp.ne.s32.totalorder %s538_s14, %s534_s13 }
   0x8   : > { %p45_p1 = scmp.eq.s32.totalorder %s44_s20, 0  ;;  %p55_p2 = scmp.eq.s32.totalorder %s542_s15, 0 }
   0x9   : > { %p60_p3 = scmp.ne.s32.totalorder %s534_s13, %s530_s12  ;;  %p61_p4 = scmp.eq.s32.totalorder %s589_s16, 0 }
   0xa   : > { %s605_s21 = scalar_select %p45_p1, %s538_s14, %s47_s19  }
   0xb   : > { %p56_p5 = por %p55_p2, %p54_p0  ;;  %p607_p6 = por %p61_p4, %p60_p3 }
   0xc   : > { %p105_p7 = scmp.eq.s32.totalorder %s589_s16, 1  ;;  %p111_p8 = scmp.eq.s32.totalorder %s357_s17, 1 }
   0xd   : > { %p359_p9 = scmp.ge.s32.totalorder %s542_s15, 2  ;;  %p407_p10 = scmp.lt.s32.totalorder %s542_s15, 2 }
   0xe   : > { %p614_p11 = por %p105_p7, %p54_p0  ;;  %p618_p12 = por %p111_p8, %p60_p3 }
   0xf   : > { %s137_s25 = sand.u32 1, %s538_s14   ;;  %s387_s26 = sshll.u32 %s542_s15, 3 }
  0x10   : > { %s393_s27 = smul.u32 40, %s137_s25  ;;  %s146_s30 = scalar_lea.hbm %s695_s1, %s387_s26 }
  0x11   : > { %p627_p13 = pnand %p407_p10, %p56_p5  ;;  %s147_s5 = sshll.u32 %s146_s30, 4  ;;  %s148_s5 = int_to_ptr.hbm [resolvable:$true] %s147_s5 }
  0x12   : > { %s141_s6 = scalar_lea.vmem [#allocation2], %s393_s27  ;;  %p362_p0 = scmp.ge.s32.totalorder %s542_s15, 1 }
  0x13   : > { %s149_s7 = sshll.u32 %s141_s6, 4  ;;  %s138_s8 = scalar_lea.sflag [#allocation3], %s137_s25  ;;  %s150_s7 = int_to_ptr.vmem [resolvable:$true] %s149_s7 }
  0x14   : > { %s446_s9 = sshra.s32 %s148_s5, 4  ;;  %p450_p2 = pneg %p627_p13  ;;  %s447_s9 = int_to_ptr.hbm [resolvable:$true] %s446_s9 }
  0x15   : > { %s448_s10 = scalar_lea.hbm %s447_s9, 40  ;;  %s453_s19 = scalar_lea.hbm %s695_s1, 80 }
  0x16   : > { %p449_p1 = scmp.ne.s32.totalorder %s447_s9, %s448_s10  ;;  %p454_p5 = scmp.lt.s32.totalorder %s447_s9, %s695_s1 }
  0x17   : > { %p455_p7 = scmp.lt.s32.totalorder %s453_s19, %s448_s10 }
  0x18   : > { %p451_p3 = pnand %p450_p2, %p449_p1 }
  0x19   : > { %p456_p8 = por %p455_p7, %p454_p5 }
  0x1a   : > { %p452_p4 = pneg %p451_p3 }
  0x1c   : > { %p457_p10 = pnand %p456_p8, %p452_p4 }
  0x1e   : > { %460 = shalt.err (!%p457_p10)
}
  0x1f   : > { %s544_s25 = smov 256   ;;  %s545_s27 = smov 128  }
  0x20   : > { %s546_s28 = smov 8   ;;  %p157_p1 = scmp.lt.s32.totalorder %s542_s15, 3 }
  0x21   : > { %402 = dma.hbm_to_vmem [thread:$0]  (!%p627_p13), %s148_s5, 640, %s150_s7, %s138_s8, %s544_s25, %s545_s27, %s546_s28  }
  0x22   : > { %p158_p2 = pnand %p362_p0, %p157_p1 }
  0x23   : > { %s646_s29 = sand.u32 (!%p158_p2), 1, %s534_s13  }
  0x24   : > { %161 = sbr.rel (%p158_p2) target bundleno = 193 (0xc1), region = 32  ;;  %s164_s6 = scalar_lea.sflag (!%p158_p2), [#allocation3], %s646_s29 }
  0x25   : > { %s394_s30 = smul.u32 (!%p158_p2), 40, %s646_s29 }
  0x27   : > { %s167_s9 = scalar_lea.vmem (!%p158_p2), [#allocation2], %s394_s30 }
  0x29   : > { %521 = dma.done.wait (%p607_p6), %s164_s6, 640  }
  0x2a   : > { %523 = vsyncadd (%p607_p6), %s164_s6, 4294966656  ;;  %v547_v0 = vmov 0   ;;  %v199_v1 = vld [vmem:[%s167_s9 + $0x20] sm:$0xff]  ;;  %vm235_vm0 = vcmask 1043456   ;;  %v374_v4 = vld [vmem:[%s167_s9 + $0x10] sm:$0xf] }
  0x2b   : > { %445 = vset.pattern.permute.xlu0 %v547_v0  ;;  %v219_v2 = vunpack.c.l.b16 %v199_v1  ;;  %v220_v3 = vunpack.c.h.b16 %v199_v1  ;;  %v391_v5 = vld [vmem:[%s167_s9 + $0x14] sm:$0xf0]  ;;  %v390_v8 = vld [vmem:[%s167_s9 + $0x14] sm:$0xf]  ;;  %v376_v9 = vld [vmem:[%s167_s9 + $0x18] sm:$0xf0] }
  0x2c   : > { %v200_v10 = vld [vmem:[%s696_s2] sm:$0xff]  ;;  %v375_v13 = vor.u32 %v391_v5, %v374_v4  ;;  %v379_v14 = vor.u32 %v390_v8, %v376_v9  ;;  %v389_v16 = vld [vmem:[%s167_s9 + $0x4] sm:$0xf0]  ;;  %v368_v18 = vld [vmem:[%s167_s9 + $0x8] sm:$0xf0]  ;;  %vm231_vm1 = vcmask 326656  }
  0x2d   : > { %v225_v6 = vpack.c.b16 %v219_v2, %v219_v2  ;;  %v226_v7 = vpack.c.b16 %v220_v3, %v220_v3  ;;  %203 = vperm.xlu0 %445, %v200_v10   ;;  %v366_v15 = vld [vmem:[%s167_s9] sm:$0xf]  ;;  %v388_v17 = vld [vmem:[%s167_s9 + $0x4] sm:$0xf]  ;;  %s392_s8 = sshll.u32 %s589_s16, 4  ;;  %s363_s10 = sshll.u32 %s646_s29, 4 }
  0x2e   : > { %v367_v19 = vor.u32 %v389_v16, %v366_v15  ;;  %v371_v20 = vor.u32 %v388_v17, %v368_v18  ;;  %v194_v21 = vld [vmem:[%s694_s0] sm:$0xf]  ;;  %s282_s19 = scalar_lea.hbm %s697_s3, %s392_s8  ;;  %s190_s20 = scalar_lea.vmem [#allocation5], %s363_s10 }
  0x2f   : > { %v237_v11 = vsel %vm235_vm0, %v225_v6, 0  ;;  %v240_v12 = vsel %vm235_vm0, %v226_v7, 0  ;;  %s284_s26 = sshll.u32 %s190_s20, 4  ;;  %s286_s25 = sshll.u32 %s282_s19, 4  ;;  %s285_s26 = int_to_ptr.vmem [resolvable:$true] %s284_s26  ;;  %s287_s25 = int_to_ptr.hbm [resolvable:$true] %s286_s25 }
  0x30   : > { %247 = vmatpush.bf16.msra.mxu0 %v237_v11  ;;  %260 = vmatpush.bf16.msra.mxu1 %v240_v12  ;;  %s271_s27 = scalar_lea.sflag [#allocation4], %s646_s29  ;;  %s490_s16 = sshra.s32 %s287_s25, 4  ;;  %s491_s16 = int_to_ptr.hbm [resolvable:$true] %s490_s16 }
  0x31   : > { %s492_s28 = scalar_lea.hbm %s491_s16, 16  ;;  %s496_s9 = scalar_lea.hbm %s697_s3, 32 }
  0x32   : > { %p493_p6 = scmp.ne.s32.totalorder %s491_s16, %s492_s28  ;;  %p497_p3 = scmp.lt.s32.totalorder %s491_s16, %s697_s3 }
  0x33   : > { %p498_p4 = scmp.lt.s32.totalorder %s496_s9, %s492_s28 }
  0x34   : > { %248 = vmatpush.bf16.msra.mxu0 %v375_v13  ;;  %261 = vmatpush.bf16.msra.mxu1 %v379_v14  ;;  %p494_p13 = pnand %p493_p6, %p614_p11 }
  0x35   : > { %p499_p5 = por %p498_p4, %p497_p3 }
  0x36   : > { %p495_p0 = pneg %p494_p13 }
  0x38   : > { %249 = vmatpush.bf16.msra.mxu0 %v367_v19  ;;  %262 = vmatpush.bf16.msra.mxu1 %v371_v20  ;;  %p500_p7 = pnand %p499_p5, %p495_p0 }
  0x3b   : > { %380 = vmatmul.msk.bf16.vlgmr.msra.gmra.mxu0 %vm231_vm1, %v194_v21  ;;  %381 = vmatmul.msk.bf16.vlgmr.msra.gmra.mxu1 %vm231_vm1, %v194_v21 }
  0x9f   : > { %v204_v22 = vpop.permute.xlu0 %203 }
  0xb8   : > { %v251_v23 = vpop.f32.mrf.mxu0  ;;  %v264_v24 = vpop.f32.mrf.mxu1 }
  0xb9   : > { %v252_v25 = vadd.f32 %v251_v23, %v204_v22  ;;  %v265_v26 = vadd.f32 %v264_v24, %v204_v22 }
  0xbb   : > { %268 = vst [vmem:[%s190_s20] sm:$0xff] %v252_v25 }
  0xbc   : > { %269 = vst [vmem:[%s190_s20 + $0x8] sm:$0xff] %v265_v26 }
  0xbd   : > { %503 = shalt.err (!%p500_p7)
}
  0xbe   : > { %397 = dma.vmem_to_hbm [thread:$0]  (%p614_p11), %s285_s26, 256, %s287_s25, %s271_s27  }
  0xc0   : > { %v253_v27 = vpop.f32.mrf.mxu0  ;;  %v266_v28 = vpop.f32.mrf.mxu1 }
  0xc1 PF: > { %s298_s29 = sand.u32 1, %s530_s12   ;;  %p404_p8 = pnand %p359_p9, %p618_p12 }
  0xc2   : > { %s299_s22 = scalar_lea.sflag [#allocation4], %s298_s29 }
  0xc3   : > { %p405_p10 = pneg %p404_p8 }
  0xc5   : > { %525 = dma.done.wait (%p405_p10), %s299_s22, 256  }
  0xc6   : > { %527 = vsyncadd (%p405_p10), %s299_s22, 4294967040  ;;  %p16_p11 = scmp.ge.s32.totalorder %s593_s18, 4   ;;  %s702_s12 = smov %s534_s13 }
  0xc7   : > { %s703_s13 = smov %s538_s14  ;;  %s704_s14 = smov %s605_s21 }
  0xc8   : > { %s705_s15 = smov %s593_s18  ;;  %18 = sbr.rel (!%p16_p11) target bundleno = 5 (0x5), region = 77 }
  0xcd   :  { %305 = vsyncpa [#allocation3], 1 }
  0xce   :  { %307 = vsyncpa [#allocation3 + $0x1], 1 }
  0xcf   :  { %308 = vsyncpa [#allocation4], 1 }
  0xd0   :  { %310 = vsyncpa [#allocation4 + $0x1], 1 }

</bundles_post_ra>
